<compile_context>
chip_gen: v6e
topology: v6e:2x2x1
jax: 0.10.0
libtpu: 0.0.40
codegen_flags: <defaults>
</compile_context>

<pallas_src>
import functools
import math

import jax
import jax.numpy as jnp
from jax.experimental import pallas as pl
from jax.experimental.pallas import tpu as pltpu

TARGET_BLOCK_BYTES = 4 * 1024 * 1024   # ~4 MiB input block (8 MiB double-buffered)
INNER_CHUNK = 512                      # rows per in-kernel matmul sub-tile


def _round_up(a, b):
    return ((a + b - 1) // b) * b


def _rate_kernel(x_ref, o_ref, *, t, inv_t, chunk):
    """x_ref: (rows, W) lane-folded input (W = G*t, multiple of 128), native dtype.
    o_ref: (rows, G) per-neuron means.  Each group g owns lanes [g*t, (g+1)*t)."""
    rows, w_lanes = x_ref.shape
    groups = o_ref.shape[1]

    # Constant 0/1 group-membership weights, built in-kernel (no HBM weight input).
    lane = jax.lax.broadcasted_iota(jnp.int32, (w_lanes, groups), 0)
    grp = jax.lax.broadcasted_iota(jnp.int32, (w_lanes, groups), 1)
    w = ((lane >= grp * t) & (lane < (grp + 1) * t)).astype(x_ref.dtype)

    n_chunks = rows // chunk           # rows is a multiple of chunk by construction

    def body(c, carry):
        r0 = pl.multiple_of(c * chunk, chunk)
        xc = x_ref[pl.ds(r0, chunk), :]                       # (chunk, W), native dtype
        acc = jnp.dot(xc, w, preferred_element_type=jnp.float32)   # MXU group sum
        o_ref[pl.ds(r0, chunk), :] = (acc * inv_t).astype(o_ref.dtype)
        return carry

    jax.lax.fori_loop(0, n_chunks, body, 0)


@jax.jit
def rate_coding(x):
    """RateCoding forward: sum over dim 2 divided by x.shape[-1].

    x: (batch, num_classes, T).  Returns (batch, num_classes) in x's float dtype.
    """
    # TODO(synk): rank != 3 inputs (where dim=2 != the last axis) are out of scope.
    assert x.ndim == 3, "RateCoding kernel expects (batch, num_classes, T)"
    N, C, T = x.shape

    if x.dtype not in (jnp.float32, jnp.bfloat16):
        # TODO(synk): int8/bool spike trains could be DMA'd natively (2-4x fewer bytes).
        x = x.astype(jnp.float32)
    out_dtype = x.dtype
    itemsize = jnp.dtype(x.dtype).itemsize

    M = N * C
    G = 128 // math.gcd(T, 128)        # neurons packed per folded row
    W = G * T                          # folded row width: lcm(T, 128), lane-dense
    R = pl.cdiv(M, G)                  # folded rows

    # Lane folding is a free view of the contiguous buffer.  Only when M is not a
    # multiple of G do we pay a small tail pad (zeros; padded outputs are dropped).
    x_flat = x.reshape(M * T)
    if M % G != 0:
        # TODO(synk): the unaligned-neuron-count case still pays one copy here.
        x_flat = jnp.pad(x_flat, (0, R * W - M * T))
    xf = x_flat.reshape(R, W)

    # Row-block sizing: ~4 MiB blocks, >=2 blocks when possible (v7x megacore),
    # rows_tile a multiple of the inner matmul chunk.
    max_rows = max(16, (TARGET_BLOCK_BYTES // (W * itemsize)) // 16 * 16)
    n_blocks = pl.cdiv(R, max_rows)
    if R >= 32:
        n_blocks = max(n_blocks, 2)
    r0 = pl.cdiv(R, n_blocks)
    if r0 > INNER_CHUNK:
        rows_tile = _round_up(r0, INNER_CHUNK)
        chunk = INNER_CHUNK
    else:
        rows_tile = _round_up(r0, 16)
        chunk = rows_tile
    n_blocks = pl.cdiv(R, rows_tile)   # non-divisible grid: Pallas masks the tail block

    kernel = functools.partial(_rate_kernel, t=T, inv_t=1.0 / T, chunk=chunk)
    out = pl.pallas_call(
        kernel,
        out_shape=jax.ShapeDtypeStruct((R, G), out_dtype),
        grid_spec=pltpu.PrefetchScalarGridSpec(
            num_scalar_prefetch=0,
            grid=(n_blocks,),
            in_specs=[pl.BlockSpec((rows_tile, W), lambda i: (i, 0))],
            out_specs=pl.BlockSpec((rows_tile, G), lambda i: (i, 0)),
        ),
        compiler_params=pltpu.CompilerParams(
            dimension_semantics=("parallel",),
            vmem_limit_bytes=32 * 1024 * 1024,
        ),
    )(xf)

    out_flat = out.reshape(R * G)
    if R * G != M:
        out_flat = out_flat[:M]
    return out_flat.reshape(N, C)


def rate_coding_ref(x):
    """Pure-JAX reference mirroring the PyTorch forward (exact f32 sum)."""
    return jnp.sum(x.astype(jnp.float32), axis=2) / x.shape[-1]


if __name__ == "__main__":
    key = jax.random.PRNGKey(0)

    # Binary spike trains (the module's domain): results are exact, so tight tolerances.
    cases = [
        ((2, 10, 8), jnp.float32),     # classic (batch, num_classes, T); tail path
        ((2, 64, 8), jnp.float32),     # aligned neuron count, single block
        ((4, 256, 16), jnp.float32),   # aligned, exercises the multi-block parallel grid
        ((2, 64, 8), jnp.bfloat16),    # native low-precision spike train (no upcast)
    ]
    for shp, dt in cases:
        key, sub = jax.random.split(key)
        x = jax.random.bernoulli(sub, 0.3, shp).astype(dt)
        out = jax.block_until_ready(rate_coding(x))
        ref = rate_coding_ref(x)
        assert out.shape == ref.shape, (shp, out.shape, ref.shape)
        assert jnp.allclose(out.astype(jnp.float32), ref, rtol=1e-6, atol=1e-6), shp

    # Non-binary f32 input and a T that does not divide 128 (W = lcm(10,128) = 640 path).
    # Tolerance covers the backend's f32 matmul contraction precision.
    key, sub = jax.random.split(key)
    x = jax.random.uniform(sub, (2, 33, 10), dtype=jnp.float32)
    out = jax.block_until_ready(rate_coding(x))
    ref = rate_coding_ref(x)
    assert out.shape == ref.shape
    assert jnp.allclose(out, ref, rtol=2e-2, atol=2e-2)

    print("KERNEL_OK")
</pallas_src>

<mosaic_0001>
module attributes {stable_mosaic.version = 11 : i64} {
  func.func @_rate_kernel(%arg0: i32, %arg1: memref<16x128xf32, #tpu.memory_space<vmem>>, %arg2: memref<16x16xf32, #tpu.memory_space<vmem>>) attributes {dimension_semantics = [#tpu.dimension_semantics<parallel>], iteration_bounds = array<i64: 1>, scalar_prefetch = 0 : i64, scratch_operands = 0 : i64, tpu.core_type = #tpu.core_type<tc>, window_params = [{transform_indices = @transform_0, window_bounds = array<i64: 16, 128>}, {transform_indices = @transform_1, window_bounds = array<i64: 16, 16>}]} {
    %0 = tpu.iota {dimensions = array<i32: 0>} : vector<128x16xi32>
    %1 = tpu.iota {dimensions = array<i32: 1>} : vector<128x16xi32>
    %c8_i32 = arith.constant 8 : i32
    %2 = vector.broadcast %c8_i32 : i32 to vector<128x16xi32>
    %3 = arith.muli %1, %2 : vector<128x16xi32>
    %4 = arith.cmpi sge, %0, %3 : vector<128x16xi32>
    %c1_i32 = arith.constant 1 : i32
    %5 = vector.broadcast %c1_i32 : i32 to vector<128x16xi32>
    %6 = arith.addi %1, %5 : vector<128x16xi32>
    %c8_i32_0 = arith.constant 8 : i32
    %7 = vector.broadcast %c8_i32_0 : i32 to vector<128x16xi32>
    %8 = arith.muli %6, %7 : vector<128x16xi32>
    %9 = arith.cmpi slt, %0, %8 : vector<128x16xi32>
    %10 = arith.andi %4, %9 : vector<128x16xi1>
    %11 = arith.extui %10 : vector<128x16xi1> to vector<128x16xi32>
    %12 = arith.sitofp %11 : vector<128x16xi32> to vector<128x16xf32>
    %c0_i32 = arith.constant 0 : i32
    %c16_i32 = arith.constant 16 : i32
    %13 = arith.muli %c0_i32, %c16_i32 : i32
    %14 = tpu.assume_multiple %13, 16 : i32
    %15 = arith.index_cast %14 : i32 to index
    %c0 = arith.constant 0 : index
    %16 = vector.load %arg1[%15, %c0] : memref<16x128xf32, #tpu.memory_space<vmem>>, vector<16x128xf32>
    %cst = arith.constant dense<0.000000e+00> : vector<16x16xf32>
    %17 = tpu.matmul %16, %12, %cst {dimension_numbers = #tpu.dot_dimension_numbers<[1], [0], [0], [1], [0, 0, 1, 1], [], []>} : vector<16x128xf32>, vector<128x16xf32>, vector<16x16xf32> -> vector<16x16xf32>
    %cst_1 = arith.constant 1.250000e-01 : f32
    %18 = vector.broadcast %cst_1 : f32 to vector<16x16xf32>
    %19 = arith.mulf %17, %18 : vector<16x16xf32>
    %20 = arith.index_cast %14 : i32 to index
    %c0_2 = arith.constant 0 : index
    %21 = vector.load %arg2[%20, %c0_2] : memref<16x16xf32, #tpu.memory_space<vmem>>, vector<16x16xf32>
    tpu.vector_store %arg2[%20, %c0_2], %19 {strides = array<i32>} : memref<16x16xf32, #tpu.memory_space<vmem>>, vector<16x16xf32>,
    %c1_i32_3 = arith.constant 1 : i32
    return
  }
  func.func @transform_0(%arg0: i32) -> (i32, i32) {
    %c0_i32 = arith.constant 0 : i32
    %c0_i32_0 = arith.constant 0 : i32
    return %arg0, %c0_i32 : i32, i32
  }
  func.func @transform_1(%arg0: i32) -> (i32, i32) {
    %c0_i32 = arith.constant 0 : i32
    %c0_i32_0 = arith.constant 0 : i32
    return %arg0, %c0_i32 : i32, i32
  }
}

</mosaic_0001>

<bundles_post_ra>
// kernel: rate_coding.1
= control target key start
LH: loop header
LB: loop body
LE: loop exit
PB: predicated region body
PF: predicated region fallthrough
CT: control target
= control target key end

     0   :  { %v8_v0 = vlaneseq  ;;  %v319_v12 = vmov 1.0   ;;  %s426_s0 = inlined_call_operand.vmem [shape: f32[2,128], index: 0, kind: input, shape index: {}]   ;;  %s427_s1 = inlined_call_operand.vmem [shape: f32[2,16], index: 1, kind: output, shape index: {}]  }
   0x1   :  { %v110_v1 = vld [vmem:[%s426_s0] sm:$0xff]  ;;  %v111_v23 = vld [vmem:[%s426_s0 + $0x8] sm:$0xff] }
   0x2   :  { %315 = vmatprep.mubr.f32.mxu0 %v110_v1  ;;  %v333_v2 = vshrl.u32 %v8_v0, 7  ;;  %v26_v3 = vand.u32 127, %v8_v0 }
   0x4   :  { %v24_v4 = vadd.s32 120, %v333_v2  ;;  %v336_v5 = vmul.u32 8, %v26_v3  ;;  %v44_v6 = vadd.s32 1, %v26_v3  ;;  %v23_v7 = vadd.s32 112, %v333_v2 }
   0x5   :  { %v22_v8 = vadd.s32 104, %v333_v2  ;;  %v21_v10 = vadd.s32 96, %v333_v2  ;;  %v20_v11 = vadd.s32 88, %v333_v2  ;;  %v19_v13 = vadd.s32 80, %v333_v2 }
   0x6   :  { %vm43_vm0 = vcmp.ge.s32.totalorder %v24_v4, %v336_v5  ;;  %v341_v9 = vmul.u32 8, %v44_v6  ;;  %vm42_vm1 = vcmp.ge.s32.totalorder %v23_v7, %v336_v5  ;;  %v18_v14 = vadd.s32 72, %v333_v2 }
   0x7   :  { %vm41_vm4 = vcmp.ge.s32.totalorder %v22_v8, %v336_v5  ;;  %vm40_vm8 = vcmp.ge.s32.totalorder %v21_v10, %v336_v5  ;;  %vm39_vm11 = vcmp.ge.s32.totalorder %v20_v11, %v336_v5  ;;  %vm38_vm14 = vcmp.ge.s32.totalorder %v19_v13, %v336_v5 }
   0x8   :  { %vm61_vm2 = vcmp.lt.s32.totalorder %v24_v4, %v341_v9  ;;  %vm60_vm3 = vcmp.lt.s32.totalorder %v23_v7, %v341_v9  ;;  %vm59_vm5 = vcmp.lt.s32.totalorder %v22_v8, %v341_v9  ;;  %vm58_vm9 = vcmp.lt.s32.totalorder %v21_v10, %v341_v9 }
   0x9   :  { %vm77_vm6 = vmand %vm43_vm0, %vm61_vm2  ;;  %vm57_vm12 = vcmp.lt.s32.totalorder %v20_v11, %v341_v9  ;;  %vm56_vm15 = vcmp.lt.s32.totalorder %v19_v13, %v341_v9  ;;  %v17_v15 = vadd.s32 64, %v333_v2  ;;  %vm55_vm2 = vcmp.lt.s32.totalorder %v18_v14, %v341_v9 }
   0xa   :  { %283 = vmatprep.subr.msk.mxu0 %vm77_vm6, %v319_v12  ;;  %vm76_vm7 = vmand %vm42_vm1, %vm60_vm3  ;;  %vm37_vm1 = vcmp.ge.s32.totalorder %v18_v14, %v336_v5  ;;  %v16_v16 = vadd.s32 56, %v333_v2  ;;  %v15_v17 = vadd.s32 48, %v333_v2  ;;  %v14_v18 = vadd.s32 40, %v333_v2 }
   0xb   :  { %284 = vmatpush3.msk.msra.mxu0 %vm77_vm6, %v319_v12  ;;  %vm75_vm10 = vmand %vm41_vm4, %vm59_vm5  ;;  %vm36_vm4 = vcmp.ge.s32.totalorder %v17_v15, %v336_v5  ;;  %vm54_vm5 = vcmp.lt.s32.totalorder %v17_v15, %v341_v9  ;;  %v13_v19 = vadd.s32 32, %v333_v2  ;;  %v12_v20 = vadd.s32 24, %v333_v2 }
   0xc   :  { %285 = vmatprep.subr.msk.mxu0 %vm76_vm7, %v319_v12  ;;  %vm74_vm13 = vmand %vm40_vm8, %vm58_vm9  ;;  %vm53_vm8 = vcmp.lt.s32.totalorder %v16_v16, %v341_v9  ;;  %v11_v21 = vadd.s32 16, %v333_v2  ;;  %v10_v22 = vadd.s32 8, %v333_v2 }
   0xd   :  { %286 = vmatpush3.msk.msra.mxu0 %vm76_vm7, %v319_v12  ;;  %vm73_vm0 = vmand %vm39_vm11, %vm57_vm12  ;;  %vm35_vm7 = vcmp.ge.s32.totalorder %v16_v16, %v336_v5  ;;  %vm52_vm11 = vcmp.lt.s32.totalorder %v15_v17, %v341_v9 }
   0xe   :  { %287 = vmatprep.subr.msk.mxu0 %vm75_vm10, %v319_v12  ;;  %vm72_vm3 = vmand %vm38_vm14, %vm56_vm15  ;;  %vm51_vm14 = vcmp.lt.s32.totalorder %v14_v18, %v341_v9 }
   0xf   :  { %288 = vmatpush3.msk.msra.mxu0 %vm75_vm10, %v319_v12  ;;  %vm71_vm6 = vmand %vm37_vm1, %vm55_vm2  ;;  %vm34_vm10 = vcmp.ge.s32.totalorder %v15_v17, %v336_v5  ;;  %vm50_vm1 = vcmp.lt.s32.totalorder %v13_v19, %v341_v9 }
  0x10   :  { %289 = vmatprep.subr.msk.mxu0 %vm74_vm13, %v319_v12  ;;  %vm70_vm9 = vmand %vm36_vm4, %vm54_vm5  ;;  %vm49_vm4 = vcmp.lt.s32.totalorder %v12_v20, %v341_v9 }
  0x11   :  { %290 = vmatpush3.msk.msra.mxu0 %vm74_vm13, %v319_v12  ;;  %vm69_vm12 = vmand %vm35_vm7, %vm53_vm8  ;;  %vm33_vm13 = vcmp.ge.s32.totalorder %v14_v18, %v336_v5  ;;  %vm48_vm7 = vcmp.lt.s32.totalorder %v11_v21, %v341_v9 }
  0x12   :  { %291 = vmatprep.subr.msk.mxu0 %vm73_vm0, %v319_v12  ;;  %vm68_vm15 = vmand %vm34_vm10, %vm52_vm11  ;;  %vm47_vm10 = vcmp.lt.s32.totalorder %v10_v22, %v341_v9 }
  0x13   :  { %292 = vmatpush3.msk.msra.mxu0 %vm73_vm0, %v319_v12  ;;  %vm32_vm0 = vcmp.ge.s32.totalorder %v13_v19, %v336_v5  ;;  %vm67_vm2 = vmand %vm33_vm13, %vm51_vm14  ;;  %vm46_vm13 = vcmp.lt.s32.totalorder %v333_v2, %v341_v9 }
  0x14   :  { %293 = vmatprep.subr.msk.mxu0 %vm72_vm3, %v319_v12  ;;  %vm66_vm5 = vmand %vm32_vm0, %vm50_vm1  ;;  %vm189_vm0 = vcmask 130048  }
  0x15   :  { %294 = vmatpush3.msk.msra.mxu0 %vm72_vm3, %v319_v12  ;;  %vm31_vm3 = vcmp.ge.s32.totalorder %v12_v20, %v336_v5 }
  0x16   :  { %295 = vmatprep.subr.msk.mxu0 %vm71_vm6, %v319_v12  ;;  %vm65_vm8 = vmand %vm31_vm3, %vm49_vm4 }
  0x17   :  { %296 = vmatpush3.msk.msra.mxu0 %vm71_vm6, %v319_v12  ;;  %vm30_vm6 = vcmp.ge.s32.totalorder %v11_v21, %v336_v5 }
  0x18   :  { %297 = vmatprep.subr.msk.mxu0 %vm70_vm9, %v319_v12  ;;  %vm64_vm11 = vmand %vm30_vm6, %vm48_vm7 }
  0x19   :  { %298 = vmatpush3.msk.msra.mxu0 %vm70_vm9, %v319_v12  ;;  %vm29_vm9 = vcmp.ge.s32.totalorder %v10_v22, %v336_v5 }
  0x1a   :  { %299 = vmatprep.subr.msk.mxu0 %vm69_vm12, %v319_v12  ;;  %vm63_vm14 = vmand %vm29_vm9, %vm47_vm10 }
  0x1b   :  { %300 = vmatpush3.msk.msra.mxu0 %vm69_vm12, %v319_v12  ;;  %vm28_vm12 = vcmp.ge.s32.totalorder %v333_v2, %v336_v5 }
  0x1c   :  { %301 = vmatprep.subr.msk.mxu0 %vm68_vm15, %v319_v12 }
  0x1d   :  { %302 = vmatpush3.msk.msra.mxu0 %vm68_vm15, %v319_v12  ;;  %vm62_vm15 = vmand %vm28_vm12, %vm46_vm13 }
  0x1e   :  { %303 = vmatprep.subr.msk.mxu0 %vm67_vm2, %v319_v12 }
  0x1f   :  { %304 = vmatpush3.msk.msra.mxu0 %vm67_vm2, %v319_v12 }
  0x20   :  { %305 = vmatprep.subr.msk.mxu0 %vm66_vm5, %v319_v12 }
  0x21   :  { %306 = vmatpush3.msk.msra.mxu0 %vm66_vm5, %v319_v12 }
  0x22   :  { %307 = vmatprep.subr.msk.mxu0 %vm65_vm8, %v319_v12 }
  0x23   :  { %308 = vmatpush3.msk.msra.mxu0 %vm65_vm8, %v319_v12 }
  0x24   :  { %309 = vmatprep.subr.msk.mxu0 %vm64_vm11, %v319_v12 }
  0x25   :  { %310 = vmatpush3.msk.msra.mxu0 %vm64_vm11, %v319_v12 }
  0x26   :  { %311 = vmatprep.subr.msk.mxu0 %vm63_vm14, %v319_v12 }
  0x27   :  { %312 = vmatpush3.msk.msra.mxu0 %vm63_vm14, %v319_v12 }
  0x28   :  { %313 = vmatprep.subr.msk.mxu0 %vm62_vm15, %v319_v12 }
  0x29   :  { %314 = vmatpush3.msk.msra.mxu0 %vm62_vm15, %v319_v12 }
  0x2a   :  { %316 = vmatmul.mubr.f32.vlgmr.msra.gmra.mxu0 %v111_v23 }
  0xea   :  { %v317_v24 = vpop.f32.mrf.mxu0 }
  0xec   :  { %v178_v25 = vpop.f32.mrf.mxu0 }
  0xed   :  { %v187_v26 = vmul.f32 0.125, %v178_v25 }
  0xef   :  { %190 = vst.msk [vmem:[#allocation2] sm:$0xff] %vm189_vm0, %v187_v26 }
  0xf6   :  { %v210_v27 = vld [vmem:[#allocation2] sm:$0x3] }
  0xf7   :  { %211 = vst [vmem:[%s427_s1] sm:$0x3] %v210_v27 }

</bundles_post_ra>
